<compile_context>
chip_gen: v7x
topology: tpu7x:2x2x1
jax: 0.10.0
libtpu: 0.0.40
codegen_flags: <defaults>
</compile_context>

<pallas_src>
import jax
import jax.numpy as jnp
from jax.experimental import pallas as pl
from jax.experimental.pallas import tpu as pltpu


# ---------------------------------------------------------------------------
# Kernels
# ---------------------------------------------------------------------------

def attention_kernel(p_ref, w1_ref, x_ref, att_ref):
    """p_ref: SMEM (4,) [bn_scale, bn_shift, conv2_w, conv2_b];
    w1_ref: (C, 1) conv1 weight; x_ref: (C, T) feature tile (input dtype);
    att_ref: (1, T) attention tile (f32)."""
    x = x_ref[...].astype(jnp.float32)                     # (C, T)
    w1 = w1_ref[...].astype(jnp.float32)                   # (C, 1)

    # conv1: 1x1 conv, C -> 1  == per-position channel reduction.
    s = jnp.sum(x * w1, axis=0, keepdims=True)             # (1, T)

    # conv1 bias + eval-mode BatchNorm2d folded into a single affine.
    # TODO(synk): training-mode BN (batch statistics) is not implemented.
    s = p_ref[0] * s + p_ref[1]

    # ReLU
    s = jnp.maximum(s, 0.0)

    # conv2: 1x1 conv, 1 -> 1  == scalar affine
    s = p_ref[2] * s + p_ref[3]

    # softplus (numerically stable): log(1 + exp(s))
    att_ref[...] = jnp.maximum(s, 0.0) + jnp.log1p(jnp.exp(-jnp.abs(s)))


def weight_apply_kernel(p_ref, x_ref, att_ref, out_ref):
    """p_ref: SMEM (2,) [a_min, inv_range]; x_ref/out_ref: (C, T); att_ref: (1, T)."""
    w = (att_ref[...] - p_ref[0]) * p_ref[1]               # (1, T)
    out_ref[...] = (w * x_ref[...].astype(jnp.float32)).astype(out_ref.dtype)


# ---------------------------------------------------------------------------
# Wrapper
# ---------------------------------------------------------------------------

def _pick_spatial_tile(hw, c, itemsize):
    """Lane-dense spatial tile: multiple of 128, x tile <= ~2 MiB (v7x-safe)."""
    max_t = max(128, ((2 * 1024 * 1024) // max(1, c * itemsize)) // 128 * 128)
    max_t = min(max_t, 2048)
    hw_pad128 = ((hw + 127) // 128) * 128
    if hw_pad128 <= max_t:
        return hw_pad128
    for cand in range(max_t, 127, -128):   # largest 128-multiple divisor of hw
        if hw % cand == 0:
            return cand
    return max_t                            # no divisor: pad to a multiple of max_t


def _delf_forward(feature_maps_nchw, conv1_w, conv1_b, bn_gamma, bn_beta,
                  bn_mean, bn_var, bn_eps, conv2_w, conv2_b):
    B, C, H, W = feature_maps_nchw.shape
    HW = H * W
    # NCHW -> (B, C, H*W): pure reshape, no transpose (keeps HBM traffic at the floor).
    x = feature_maps_nchw.reshape(B, C, HW)
    itemsize = jnp.dtype(x.dtype).itemsize

    T = _pick_spatial_tile(HW, C, itemsize)
    HWp = ((HW + T - 1) // T) * T
    if HWp != HW:
        x = jnp.pad(x, ((0, 0), (0, 0), (0, HWp - HW)))
    grid = (B, HWp // T)

    w1 = conv1_w.reshape(C, 1).astype(jnp.float32)

    # Fold conv1 bias + eval-mode BN into one affine: bn_scale * s + bn_shift.
    bn_scale = jnp.asarray(bn_gamma, jnp.float32) / jnp.sqrt(
        jnp.asarray(bn_var, jnp.float32) + jnp.asarray(bn_eps, jnp.float32))
    bn_shift = jnp.asarray(bn_beta, jnp.float32) + bn_scale * (
        jnp.asarray(conv1_b, jnp.float32) - jnp.asarray(bn_mean, jnp.float32))
    params1 = jnp.stack([bn_scale, bn_shift,
                         jnp.asarray(conv2_w, jnp.float32),
                         jnp.asarray(conv2_b, jnp.float32)])

    # ---- Pass 1: attention map -------------------------------------------
    att = pl.pallas_call(
        attention_kernel,
        out_shape=jax.ShapeDtypeStruct((B, 1, HWp), jnp.float32),
        grid=grid,
        in_specs=[
            pl.BlockSpec(memory_space=pltpu.MemorySpace.SMEM),      # scalar params
            pl.BlockSpec((C, 1), lambda b, j: (0, 0)),              # conv1 weight
            pl.BlockSpec((None, C, T), lambda b, j: (b, 0, j)),     # x tile
        ],
        out_specs=pl.BlockSpec((None, 1, T), lambda b, j: (b, 0, j)),
        compiler_params=pltpu.CompilerParams(
            dimension_semantics=("parallel", "parallel")),
        cost_estimate=pl.CostEstimate(
            flops=int(B * HWp * (2 * C + 8)),
            transcendentals=int(2 * B * HWp),
            bytes_accessed=int(B * C * HWp * itemsize + B * HWp * 4 + C * 4)),
    )(params1, w1, x)

    # ---- Global min/max over the (small) attention tensor in plain JAX ----
    att_valid = att[:, :, :HW] if HWp != HW else att
    a_min = jnp.min(att_valid)
    a_max = jnp.max(att_valid)
    rng = a_max - a_min
    # Guard the degenerate constant-attention case (reference would produce NaN).
    inv_range = jnp.where(
        rng > 0,
        1.0 / jnp.maximum(rng, jnp.finfo(jnp.float32).tiny),
        jnp.float32(0.0))
    params2 = jnp.stack([a_min, inv_range]).astype(jnp.float32)

    # ---- Pass 2: weight * feature_maps ------------------------------------
    # Note: input_output_aliases={1: 0} is intentionally omitted — here x aliases
    # a non-donated entry parameter, so XLA would insert a full copy to honor it.
    out = pl.pallas_call(
        weight_apply_kernel,
        out_shape=jax.ShapeDtypeStruct((B, C, HWp), x.dtype),
        grid=grid,
        in_specs=[
            pl.BlockSpec(memory_space=pltpu.MemorySpace.SMEM),      # [a_min, inv_range]
            pl.BlockSpec((None, C, T), lambda b, j: (b, 0, j)),     # x tile
            pl.BlockSpec((None, 1, T), lambda b, j: (b, 0, j)),     # attention tile
        ],
        out_specs=pl.BlockSpec((None, C, T), lambda b, j: (b, 0, j)),
        compiler_params=pltpu.CompilerParams(
            dimension_semantics=("parallel", "parallel")),
        cost_estimate=pl.CostEstimate(
            flops=int(3 * B * C * HWp),
            transcendentals=0,
            bytes_accessed=int(2 * B * C * HWp * itemsize + B * HWp * 4)),
    )(params2, x, att)

    if HWp != HW:
        out = out[:, :, :HW]
    return out.reshape(B, C, H, W)


delf_forward = jax.jit(_delf_forward)


# ---------------------------------------------------------------------------
# Pure-JAX reference (mirrors the PyTorch forward, eval-mode BN)
# ---------------------------------------------------------------------------

def delf_reference(fm, conv1_w, conv1_b, bn_gamma, bn_beta, bn_mean, bn_var,
                   bn_eps, conv2_w, conv2_b):
    interim = jnp.sum(fm * conv1_w[None, :, None, None], axis=1,
                      keepdims=True) + conv1_b
    interim = bn_gamma * (interim - bn_mean) / jnp.sqrt(bn_var + bn_eps) + bn_beta
    interim = jax.nn.relu(interim)
    interim = conv2_w * interim + conv2_b
    attention = jax.nn.softplus(interim)
    weight = (attention - attention.min()) / (attention.max() - attention.min())
    return weight * fm


if __name__ == "__main__":
    key = jax.random.PRNGKey(0)
    B, C, H, W = 2, 8, 16, 16          # C == target_channels
    num_classes = 10                    # fc is unused in forward()

    k_x, k_w1, k_b1, k_w2, k_b2 = jax.random.split(key, 5)

    # base_model == identity: the input already is the feature map (B, C, H, W)
    feature_maps = jax.random.normal(k_x, (B, C, H, W), dtype=jnp.float32)

    # conv1: Conv2d(C, 1, kernel_size=1)  -> weight (1, C, 1, 1), bias (1,)
    bound1 = 1.0 / jnp.sqrt(jnp.float32(C))
    conv1_w = jax.random.uniform(k_w1, (C,), jnp.float32, -bound1, bound1)
    conv1_b = jax.random.uniform(k_b1, (), jnp.float32, -bound1, bound1)

    # bn1: BatchNorm2d(1) default init (eval-mode running stats)
    bn_gamma, bn_beta = jnp.float32(1.0), jnp.float32(0.0)
    bn_mean, bn_var, bn_eps = jnp.float32(0.0), jnp.float32(1.0), jnp.float32(1e-5)

    # conv2: Conv2d(1, 1, kernel_size=1) -> scalar weight + bias
    conv2_w = jax.random.uniform(k_w2, (), jnp.float32, -1.0, 1.0)
    conv2_b = jax.random.uniform(k_b2, (), jnp.float32, -1.0, 1.0)

    out = delf_forward(feature_maps, conv1_w, conv1_b, bn_gamma, bn_beta,
                       bn_mean, bn_var, bn_eps, conv2_w, conv2_b)
    out = jax.block_until_ready(out)

    ref = delf_reference(feature_maps, conv1_w, conv1_b, bn_gamma, bn_beta,
                         bn_mean, bn_var, bn_eps, conv2_w, conv2_b)

    assert out.shape == (B, C, H, W)
    assert jnp.allclose(out, ref, atol=1e-5, rtol=1e-5), "mismatch vs reference"
    print("KERNEL_OK")
</pallas_src>

<mosaic_0001>
module attributes {stable_mosaic.version = 11 : i64} {
  func.func @attention_kernel(%arg0: i32, %arg1: i32, %arg2: memref<4xf32, #tpu.memory_space<smem>>, %arg3: memref<8x1xf32, #tpu.memory_space<vmem>>, %arg4: memref<1x8x256xf32, #tpu.memory_space<vmem>>, %arg5: memref<1x1x256xf32, #tpu.memory_space<vmem>>) attributes {dimension_semantics = [#tpu.dimension_semantics<parallel>, #tpu.dimension_semantics<parallel>], iteration_bounds = array<i64: 2, 1>, scalar_prefetch = 0 : i64, scratch_operands = 0 : i64, tpu.core_type = #tpu.core_type<tc>, window_params = [{transform_indices = @transform_0, window_bounds = array<i64: 4>}, {pipeline_mode = #tpu.pipeline_mode<synchronous>, transform_indices = @transform_1, window_bounds = array<i64: 8, 1>}, {transform_indices = @transform_2, window_bounds = array<i64: 1, 8, 256>}, {transform_indices = @transform_3, window_bounds = array<i64: 1, 1, 256>}]} {
    %c0 = arith.constant 0 : index
    %c0_0 = arith.constant 0 : index
    %c0_1 = arith.constant 0 : index
    %0 = vector.load %arg4[%c0, %c0_0, %c0_1] : memref<1x8x256xf32, #tpu.memory_space<vmem>>, vector<1x8x256xf32>
    %1 = vector.shape_cast %0 : vector<1x8x256xf32> to vector<8x256xf32>
    %c0_2 = arith.constant 0 : index
    %c0_3 = arith.constant 0 : index
    %2 = vector.load %arg3[%c0_2, %c0_3] : memref<8x1xf32, #tpu.memory_space<vmem>>, vector<8x1xf32>
    %3 = vector.broadcast %2 : vector<8x1xf32> to vector<8x256xf32>
    %4 = arith.mulf %1, %3 : vector<8x256xf32>
    %cst = arith.constant dense<0.000000e+00> : vector<256xf32>
    %5 = vector.multi_reduction <add>, %4, %cst [0] : vector<8x256xf32> to vector<256xf32>
    %6 = vector.shape_cast %5 : vector<256xf32> to vector<1x256xf32>
    %c0_4 = arith.constant 0 : index
    %7 = memref.load %arg2[%c0_4] : memref<4xf32, #tpu.memory_space<smem>>
    %8 = vector.broadcast %7 : f32 to vector<1x256xf32>
    %9 = arith.mulf %8, %6 : vector<1x256xf32>
    %c1 = arith.constant 1 : index
    %10 = memref.load %arg2[%c1] : memref<4xf32, #tpu.memory_space<smem>>
    %11 = vector.broadcast %10 : f32 to vector<1x256xf32>
    %12 = arith.addf %9, %11 : vector<1x256xf32>
    %cst_5 = arith.constant 0.000000e+00 : f32
    %13 = vector.broadcast %cst_5 : f32 to vector<1x256xf32>
    %14 = arith.maximumf %12, %13 : vector<1x256xf32>
    %c2 = arith.constant 2 : index
    %15 = memref.load %arg2[%c2] : memref<4xf32, #tpu.memory_space<smem>>
    %16 = vector.broadcast %15 : f32 to vector<1x256xf32>
    %17 = arith.mulf %16, %14 : vector<1x256xf32>
    %c3 = arith.constant 3 : index
    %18 = memref.load %arg2[%c3] : memref<4xf32, #tpu.memory_space<smem>>
    %19 = vector.broadcast %18 : f32 to vector<1x256xf32>
    %20 = arith.addf %17, %19 : vector<1x256xf32>
    %cst_6 = arith.constant 0.000000e+00 : f32
    %21 = vector.broadcast %cst_6 : f32 to vector<1x256xf32>
    %22 = arith.maximumf %20, %21 : vector<1x256xf32>
    %23 = math.absf %20 : vector<1x256xf32>
    %cst_7 = arith.constant 0.000000e+00 : f32
    %24 = vector.broadcast %cst_7 : f32 to vector<1x256xf32>
    %25 = arith.subf %24, %23 : vector<1x256xf32>
    %26 = math.exp %25 : vector<1x256xf32>
    %27 = math.log1p %26 : vector<1x256xf32>
    %28 = arith.addf %22, %27 : vector<1x256xf32>
    %c0_8 = arith.constant 0 : index
    %c0_9 = arith.constant 0 : index
    %c0_10 = arith.constant 0 : index
    %29 = vector.load %arg5[%c0_8, %c0_9, %c0_10] : memref<1x1x256xf32, #tpu.memory_space<vmem>>, vector<1x1x256xf32>
    %30 = vector.shape_cast %29 : vector<1x1x256xf32> to vector<1x256xf32>
    %31 = vector.shape_cast %28 : vector<1x256xf32> to vector<1x1x256xf32>
    tpu.vector_store %arg5[%c0_8, %c0_9, %c0_10], %31 {strides = array<i32>} : memref<1x1x256xf32, #tpu.memory_space<vmem>>, vector<1x1x256xf32>,
    return
  }
  func.func @transform_0(%arg0: i32, %arg1: i32) -> i32 {
    %c0_i32 = arith.constant 0 : i32
    %c0_i32_0 = arith.constant 0 : i32
    return %c0_i32 : i32
  }
  func.func @transform_1(%arg0: i32, %arg1: i32) -> (i32, i32) {
    %c0_i32 = arith.constant 0 : i32
    %c0_i32_0 = arith.constant 0 : i32
    %c0_i32_1 = arith.constant 0 : i32
    return %c0_i32, %c0_i32_0 : i32, i32
  }
  func.func @transform_2(%arg0: i32, %arg1: i32) -> (i32, i32, i32) {
    %c0_i32 = arith.constant 0 : i32
    %c0_i32_0 = arith.constant 0 : i32
    return %arg0, %c0_i32, %arg1 : i32, i32, i32
  }
  func.func @transform_3(%arg0: i32, %arg1: i32) -> (i32, i32, i32) {
    %c0_i32 = arith.constant 0 : i32
    %c0_i32_0 = arith.constant 0 : i32
    return %arg0, %c0_i32, %arg1 : i32, i32, i32
  }
}

module attributes {stable_mosaic.version = 11 : i64} {
  func.func @weight_apply_kernel(%arg0: i32, %arg1: i32, %arg2: memref<2xf32, #tpu.memory_space<smem>>, %arg3: memref<1x8x256xf32, #tpu.memory_space<vmem>>, %arg4: memref<1x1x256xf32, #tpu.memory_space<vmem>>, %arg5: memref<1x8x256xf32, #tpu.memory_space<vmem>>) attributes {dimension_semantics = [#tpu.dimension_semantics<parallel>, #tpu.dimension_semantics<parallel>], iteration_bounds = array<i64: 2, 1>, scalar_prefetch = 0 : i64, scratch_operands = 0 : i64, tpu.core_type = #tpu.core_type<tc>, window_params = [{transform_indices = @transform_0, window_bounds = array<i64: 2>}, {transform_indices = @transform_1, window_bounds = array<i64: 1, 8, 256>}, {transform_indices = @transform_2, window_bounds = array<i64: 1, 1, 256>}, {transform_indices = @transform_3, window_bounds = array<i64: 1, 8, 256>}]} {
    %c0 = arith.constant 0 : index
    %c0_0 = arith.constant 0 : index
    %c0_1 = arith.constant 0 : index
    %0 = vector.load %arg4[%c0, %c0_0, %c0_1] : memref<1x1x256xf32, #tpu.memory_space<vmem>>, vector<1x1x256xf32>
    %1 = vector.shape_cast %0 : vector<1x1x256xf32> to vector<1x256xf32>
    %c0_2 = arith.constant 0 : index
    %2 = memref.load %arg2[%c0_2] : memref<2xf32, #tpu.memory_space<smem>>
    %3 = vector.broadcast %2 : f32 to vector<1x256xf32>
    %4 = arith.subf %1, %3 : vector<1x256xf32>
    %c1 = arith.constant 1 : index
    %5 = memref.load %arg2[%c1] : memref<2xf32, #tpu.memory_space<smem>>
    %6 = vector.broadcast %5 : f32 to vector<1x256xf32>
    %7 = arith.mulf %4, %6 : vector<1x256xf32>
    %c0_3 = arith.constant 0 : index
    %c0_4 = arith.constant 0 : index
    %c0_5 = arith.constant 0 : index
    %8 = vector.load %arg3[%c0_3, %c0_4, %c0_5] : memref<1x8x256xf32, #tpu.memory_space<vmem>>, vector<1x8x256xf32>
    %9 = vector.shape_cast %8 : vector<1x8x256xf32> to vector<8x256xf32>
    %10 = vector.broadcast %7 : vector<1x256xf32> to vector<8x256xf32>
    %11 = arith.mulf %10, %9 : vector<8x256xf32>
    %c0_6 = arith.constant 0 : index
    %c0_7 = arith.constant 0 : index
    %c0_8 = arith.constant 0 : index
    %12 = vector.load %arg5[%c0_6, %c0_7, %c0_8] : memref<1x8x256xf32, #tpu.memory_space<vmem>>, vector<1x8x256xf32>
    %13 = vector.shape_cast %12 : vector<1x8x256xf32> to vector<8x256xf32>
    %14 = vector.shape_cast %11 : vector<8x256xf32> to vector<1x8x256xf32>
    tpu.vector_store %arg5[%c0_6, %c0_7, %c0_8], %14 {strides = array<i32>} : memref<1x8x256xf32, #tpu.memory_space<vmem>>, vector<1x8x256xf32>,
    return
  }
  func.func @transform_0(%arg0: i32, %arg1: i32) -> i32 {
    %c0_i32 = arith.constant 0 : i32
    %c0_i32_0 = arith.constant 0 : i32
    return %c0_i32 : i32
  }
  func.func @transform_1(%arg0: i32, %arg1: i32) -> (i32, i32, i32) {
    %c0_i32 = arith.constant 0 : i32
    %c0_i32_0 = arith.constant 0 : i32
    return %arg0, %c0_i32, %arg1 : i32, i32, i32
  }
  func.func @transform_2(%arg0: i32, %arg1: i32) -> (i32, i32, i32) {
    %c0_i32 = arith.constant 0 : i32
    %c0_i32_0 = arith.constant 0 : i32
    return %arg0, %c0_i32, %arg1 : i32, i32, i32
  }
  func.func @transform_3(%arg0: i32, %arg1: i32) -> (i32, i32, i32) {
    %c0_i32 = arith.constant 0 : i32
    %c0_i32_0 = arith.constant 0 : i32
    return %arg0, %c0_i32, %arg1 : i32, i32, i32
  }
}

</mosaic_0001>

<bundles_post_ra>
// kernel: _delf_forward.2
= control target key start
LH: loop header
LB: loop body
LE: loop exit
PB: predicated region body
PF: predicated region fallthrough
CT: control target
= control target key end

     0   :  { %8 = vsyncpa [#allocation3], 0  ;;  %s536_s12 = smov 0   ;;  %s538_s13 = smov 0   ;;  %s602_s0 = inlined_call_operand.vmem [shape: f32[4], index: 0, kind: input, shape index: {}]   ;;  %s603_s1 = inlined_call_operand.vmem [shape: f32[8,1], index: 1, kind: input, shape index: {}]   ;;  %s604_s2 = inlined_call_operand.vmem [shape: f32[2,8,256], index: 2, kind: input, shape index: {}]   ;;  %s605_s3 = inlined_call_operand.vmem [shape: f32[2,1,256], index: 3, kind: output, shape index: {}]  }
   0x1   :  { %s540_s14 = smov 0  }
   0x2 LB: > { %s408_s15 = sadd.s32 4294967295, %s511_s14   ;;  %s26_s16 = sadd.s32 1, %s507_s13  ;;  %s511_s14 = sphi %s540_s14, %s14_s14   ;;  %s507_s13 = sphi %s538_s13, %s609_s13   ;;  %s503_s12 = sphi %s536_s12, %s608_s12  }
   0x3   : > { %p28_p0 = scmp.ge.s32.totalorder %s26_s16, 2  ;;  %p410_p1 = scmp.ge.s32.totalorder %s511_s14, 1 }
   0x4   : > { %p129_p2 = scmp.lt.s32.totalorder %s511_s14, 3  ;;  %p561_p4 = scmp.eq.s32.totalorder %s408_s15, 0 }
   0x5   : > { %s611_s16 = smov (%p28_p0, %s26_s16), 0  ;;  %s142_s21 = sshll.u32 %s602_s0, 4  ;;  %s143_s21 = int_to_ptr.vmem [resolvable:$true] %s142_s21 }
   0x6   : > { %p557_p3 = pnand %p410_p1, %p129_p2  ;;  %s470_s22 = scalar_lea.vmem %s143_s21, 16 }
   0x7   : > { %p471_p7 = scmp.ne.s32.totalorder %s143_s21, %s470_s22  ;;  %p478_p11 = scmp.lt.s32.totalorder %s143_s21, %s143_s21 }
   0x8   : > { %p428_p5 = pneg %p557_p3  ;;  %p479_p12 = scmp.lt.s32.totalorder %s470_s22, %s470_s22 }
   0xa   : > { %p429_p6 = pnand %p561_p4, %p428_p5  ;;  %p480_p13 = por %p479_p12, %p478_p11 }
   0xc   : > { %p472_p8 = pneg %p429_p6 }
   0xe   : > { %p473_p9 = pnand %p472_p8, %p471_p7 }
  0x10   : > { %p474_p10 = pneg %p473_p9 }
  0x12   : > { %p481_p0 = pnand %p480_p13, %p474_p10 }
  0x14   : > { %484 = shalt.err (!%p481_p0)
}
  0x15   : > { %s513_s23 = smov [#allocation2]   ;;  %171 = sbr.rel (%p557_p3) target bundleno = 228 (0xe4), region = 32 }
  0x16   : > { %431 = dma.vmem_to_smem (!%p429_p6), %s143_s21, 16, %s513_s23, [#allocation3]  }
  0x1c   : > { %498 = dma.done.wait (%p561_p4), [#allocation3], 16  }
  0x1d   : > { %500 = vsyncadd (%p561_p4), [#allocation3], 4294967280 }
  0x1e   : > { %177 = sfence }
  0x1f   : > { %v224_v0 = vld [vmem:[%s603_s1] sm:$0xff]  ;;  %v514_v1 = vmov 0   ;;  %p204_p1 = scmp.lt.s32.totalorder %s503_s12, 1  ;;  %s244_s30 = sld [smem:[#allocation2]]  ;;  %v515_v45 = vmov 1966171168   ;;  %v298_v47 = vlaneseq }
  0x20   : > { %461 = vset.pattern.permute.xlu0 %v514_v1  ;;  %s418_s4 = sld [smem:[#allocation2 + $0x1]]  ;;  %s419_s5 = sld [smem:[#allocation2 + $0x2]]  ;;  %v296_v46 = vunpack.c.l.s4 %v515_v45 }
  0x21   : > { %227 = vperm.xlu0 %461, %v224_v0   ;;  %s613_s12 = smov (!%p204_p1, %s503_s12), 1  ;;  %s420_s6 = sld [smem:[#allocation2 + $0x3]]  ;;  %v299_v55 = vshrl.u32 %v298_v47, 7  ;;  %vm312_vm2 = vcmp.lt.s32.totalorder %v298_v47, 256 }
  0x22   : > { %s423_s26 = sshll.u32 %s613_s12, 4  ;;  %v297_v54 = vunpack.c.0.s8 %v296_v46  ;;  %s417_s7 = sshll.u32 %s613_s12, 1 }
  0x23   : > { %s211_s29 = scalar_lea.vmem %s604_s2, %s423_s26  ;;  %s220_s10 = scalar_lea.vmem %s605_s3, %s417_s7 }
  0x24   : > { %v222_v2 = vld [vmem:[%s211_s29] sm:$0xff]  ;;  %v223_v3 = vld [vmem:[%s211_s29 + $0x8] sm:$0xff]  ;;  %v300_v1 = vsub.s32 %v297_v54, %v299_v55 }
  0x25   : > { %v245_v17 = vstv %s244_s30 }
  0x26   : > { %v249_v20 = vstv %s418_s4  ;;  %v255_v25 = vstv %s419_s5 }
  0x27   : > { %v259_v28 = vstv %s420_s6 }
  0xa0   : > { %v228_v4 = vpop.permute.xlu0 %227 }
  0xa1   : > { %v230_v5 = vmul.f32 %v228_v4, %v222_v2  ;;  %v231_v6 = vmul.f32 %v228_v4, %v223_v3 }
  0xa3   : > { %v232_v7 = vrot.slane %v230_v5, 4  ;;  %v238_v8 = vrot.slane %v231_v6, 4 }
  0xa5   : > { %v233_v9 = vadd.f32 %v232_v7, %v230_v5  ;;  %v239_v10 = vadd.f32 %v238_v8, %v231_v6 }
  0xa7   : > { %v234_v11 = vrot.slane %v233_v9, 2  ;;  %v240_v12 = vrot.slane %v239_v10, 2 }
  0xa9   : > { %v235_v13 = vadd.f32 %v234_v11, %v233_v9  ;;  %v241_v14 = vadd.f32 %v240_v12, %v239_v10 }
  0xab   : > { %v236_v15 = vrot.slane %v235_v13, 1  ;;  %v242_v16 = vrot.slane %v241_v14, 1 }
  0xad   : > { %v237_v18 = vadd.f32 %v236_v15, %v235_v13  ;;  %v243_v19 = vadd.f32 %v242_v16, %v241_v14 }
  0xaf   : > { %v246_v21 = vmul.f32 %v245_v17, %v237_v18  ;;  %v247_v22 = vmul.f32 %v245_v17, %v243_v19 }
  0xb1   : > { %v250_v23 = vadd.f32 %v249_v20, %v246_v21  ;;  %v251_v24 = vadd.f32 %v249_v20, %v247_v22 }
  0xb3   : > { %v252_v26 = vmax.f32 %v250_v23, 0.0  ;;  %v253_v27 = vmax.f32 %v251_v24, 0.0 }
  0xb5   : > { %v256_v29 = vmul.f32 %v255_v25, %v252_v26  ;;  %v257_v30 = vmul.f32 %v255_v25, %v253_v27 }
  0xb7   : > { %v260_v31 = vadd.f32 %v259_v28, %v256_v29  ;;  %v261_v32 = vadd.f32 %v259_v28, %v257_v30 }
  0xb9   : > { %v264_v33 = vand.u32 2147483647, %v260_v31  ;;  %v265_v34 = vand.u32 2147483647, %v261_v32  ;;  %v262_v58 = vmax.f32 %v260_v31, 0.0  ;;  %v263_v61 = vmax.f32 %v261_v32, 0.0 }
  0xbb   : > { %v266_v35 = vsub.f32 0.0, %v264_v33  ;;  %v267_v36 = vsub.f32 0.0, %v265_v34 }
  0xbd   : > { %v268_v37 = vmul.f32 1.442695, %v266_v35  ;;  %v270_v38 = vmul.f32 1.442695, %v267_v36 }
  0xbf   : > { %462 = vpow2.f32 %v268_v37 }
  0xc0   : > { %464 = vpow2.f32 %v270_v38 }
  0xc9   : > { %v463_v39 = vpop.eup %462 }
  0xca   : > { %v465_v40 = vpop.eup %464  ;;  %v272_v41 = vadd.f32 1.0, %v463_v39  ;;  %v275_v43 = vmul.f32 -0.5, %v463_v39  ;;  %v278_v49 = vand.u32 2147483647, %v463_v39 }
  0xcb   : > { %v281_v42 = vadd.f32 1.0, %v465_v40  ;;  %v284_v44 = vmul.f32 -0.5, %v465_v40  ;;  %v287_v51 = vand.u32 2147483647, %v465_v40 }
  0xcc   : > { %466 = vlog2.f32 %v272_v41  ;;  %v276_v48 = vadd.f32 1.0, %v275_v43  ;;  %vm279_vm0 = vcmp.lt.f32.partialorder %v278_v49, 0.0004427343 }
  0xcd   : > { %468 = vlog2.f32 %v281_v42  ;;  %v285_v50 = vadd.f32 1.0, %v284_v44  ;;  %vm288_vm1 = vcmp.lt.f32.partialorder %v287_v51, 0.0004427343 }
  0xce   : > { %v277_v57 = vmul.f32 %v463_v39, %v276_v48 }
  0xcf   : > { %v286_v60 = vmul.f32 %v465_v40, %v285_v50 }
  0xd6   : > { %v467_v52 = vpop.eup %466 }
  0xd7   : > { %v469_v53 = vpop.eup %468  ;;  %v274_v56 = vmul.f32 0.6931472, %v467_v52 }
  0xd8   : > { %v283_v59 = vmul.f32 0.6931472, %v469_v53 }
  0xd9   : > { %v280_v62 = vsel %vm279_vm0, %v277_v57, %v274_v56 }
  0xda   : > { %v289_v63 = vsel %vm288_vm1, %v286_v60, %v283_v59  ;;  %v290_v0 = vadd.f32 %v280_v62, %v262_v58 }
  0xdb   : > { %v291_v2 = vadd.f32 %v289_v63, %v263_v61 }
  0xdd   : > { %v294_v3 = vcombine.low %v290_v0, %v291_v2 }
  0xdf   : > { %v301_v4 = vrot.slane %v294_v3, %v300_v1 }
  0xe1   : > { %v308_v5 = vrot.slane %v301_v4, %v300_v1 }
  0xe3   : > { %314 = vst.msk [vmem:[%s220_s10] sm:$0x3] %vm312_vm2, %v308_v5 }
  0xe4 PF: > { %s14_s14 = sadd.s32 1, %s511_s14   ;;  %s608_s12 = smov %s507_s13 }
  0xe5   : > { %p11_p2 = scmp.ge.s32.totalorder %s14_s14, 4   ;;  %s609_s13 = smov %s611_s16 }
  0xe7   :  { %13 = sbr.rel (!%p11_p2) target bundleno = 2 (0x2), region = 67 }
  0xee   :  { %343 = vsyncpa [#allocation3], 1 }
  0xef   :  { %345 = vsyncpa [#allocation3 + $0x1], 1 }

// kernel: _delf_forward.3
= control target key start
LH: loop header
LB: loop body
LE: loop exit
PB: predicated region body
PF: predicated region fallthrough
CT: control target
= control target key end

     0   :  { %8 = vsyncpa [#allocation3], 0  ;;  %s511_s12 = smov 0   ;;  %s513_s13 = smov 0   ;;  %s573_s0 = inlined_call_operand.vmem [shape: f32[2], index: 0, kind: input, shape index: {}]   ;;  %s574_s1 = inlined_call_operand.vmem [shape: f32[2,8,256], index: 1, kind: input, shape index: {}]   ;;  %s575_s2 = inlined_call_operand.vmem [shape: f32[2,1,256], index: 2, kind: input, shape index: {}]   ;;  %s576_s3 = inlined_call_operand.vmem [shape: f32[2,8,256], index: 3, kind: output, shape index: {}]  }
   0x1   :  { %s515_s14 = smov 0  }
   0x2 LB: > { %s395_s15 = sadd.s32 4294967295, %s488_s14   ;;  %s26_s16 = sadd.s32 1, %s484_s13  ;;  %s488_s14 = sphi %s515_s14, %s14_s14   ;;  %s484_s13 = sphi %s513_s13, %s580_s13   ;;  %s480_s12 = sphi %s511_s12, %s579_s12  }
   0x3   : > { %p28_p0 = scmp.ge.s32.totalorder %s26_s16, 2  ;;  %p397_p1 = scmp.ge.s32.totalorder %s488_s14, 1 }
   0x4   : > { %p136_p2 = scmp.lt.s32.totalorder %s488_s14, 3  ;;  %p536_p4 = scmp.eq.s32.totalorder %s395_s15, 0 }
   0x5   : > { %s582_s16 = smov (%p28_p0, %s26_s16), 0  ;;  %s149_s21 = sshll.u32 %s573_s0, 4  ;;  %s150_s21 = int_to_ptr.vmem [resolvable:$true] %s149_s21 }
   0x6   : > { %p532_p3 = pnand %p397_p1, %p136_p2  ;;  %s447_s22 = scalar_lea.vmem %s150_s21, 16 }
   0x7   : > { %p448_p7 = scmp.ne.s32.totalorder %s150_s21, %s447_s22  ;;  %p455_p11 = scmp.lt.s32.totalorder %s150_s21, %s150_s21 }
   0x8   : > { %p416_p5 = pneg %p532_p3  ;;  %p456_p12 = scmp.lt.s32.totalorder %s447_s22, %s447_s22 }
   0xa   : > { %p417_p6 = pnand %p536_p4, %p416_p5  ;;  %p457_p13 = por %p456_p12, %p455_p11 }
   0xc   : > { %p449_p8 = pneg %p417_p6 }
   0xe   : > { %p450_p9 = pnand %p449_p8, %p448_p7 }
  0x10   : > { %p451_p10 = pneg %p450_p9 }
  0x12   : > { %p458_p0 = pnand %p457_p13, %p451_p10 }
  0x14   : > { %461 = shalt.err (!%p458_p0)
}
  0x15   : > { %s490_s23 = smov [#allocation2]   ;;  %187 = sbr.rel (%p532_p3) target bundleno = 47 (0x2f), region = 32 }
  0x16   : > { %419 = dma.vmem_to_smem (!%p417_p6), %s150_s21, 16, %s490_s23, [#allocation3]  }
  0x1c   : > { %475 = dma.done.wait (%p536_p4), [#allocation3], 16  }
  0x1d   : > { %477 = vsyncadd (%p536_p4), [#allocation3], 4294967280 }
  0x1e   : > { %193 = sfence }
  0x1f   : > { %p229_p1 = scmp.lt.s32.totalorder %s480_s12, 1  ;;  %s258_s24 = sld [smem:[#allocation2]]  ;;  %v267_v0 = vlaneseq }
  0x20   : > { %s407_s25 = sld [smem:[#allocation2 + $0x1]] }
  0x21   : > { %s584_s12 = smov (!%p229_p1, %s480_s12), 1  ;;  %v268_v1 = vshrl.u32 %v267_v0, 7 }
  0x22   : > { %s410_s26 = sshll.u32 %s584_s12, 4  ;;  %s404_s27 = sshll.u32 %s584_s12, 1 }
  0x23   : > { %s245_s30 = scalar_lea.vmem %s575_s2, %s404_s27  ;;  %s236_s6 = scalar_lea.vmem %s574_s1, %s410_s26  ;;  %v269_v6 = vsub.s32 0, %v268_v1  ;;  %v273_v7 = vsub.s32 1, %v268_v1 }
  0x24   : > { %v257_v2 = vld [vmem:[%s245_s30] sm:$0x3]  ;;  %v265_v10 = vld [vmem:[%s236_s6 + $0x8] sm:$0xff]  ;;  %s255_s9 = scalar_lea.vmem %s576_s3, %s410_s26 }
  0x25   : > { %v259_v3 = vstv %s258_s24  ;;  %v264_v9 = vld [vmem:[%s236_s6] sm:$0xff] }
  0x26   : > { %v260_v4 = vsub.f32 %v257_v2, %v259_v3  ;;  %v262_v5 = vstv %s407_s25 }
  0x28   : > { %v263_v8 = vmul.f32 %v262_v5, %v260_v4 }
  0x2a   : > { %v270_v11 = vrot.slane %v263_v8, %v269_v6  ;;  %v274_v12 = vrot.slane %v263_v8, %v273_v7 }
  0x2c   : > { %v277_v13 = vmul.f32 %v270_v11, %v264_v9  ;;  %v278_v14 = vmul.f32 %v274_v12, %v265_v10 }
  0x2e   : > { %279 = vst [vmem:[%s255_s9] sm:$0xff] %v277_v13  ;;  %280 = vst [vmem:[%s255_s9 + $0x8] sm:$0xff] %v278_v14 }
  0x2f PF: > { %s14_s14 = sadd.s32 1, %s488_s14   ;;  %s579_s12 = smov %s484_s13 }
  0x30   : > { %p11_p2 = scmp.ge.s32.totalorder %s14_s14, 4   ;;  %s580_s13 = smov %s582_s16 }
  0x32   :  { %13 = sbr.rel (!%p11_p2) target bundleno = 2 (0x2), region = 70 }
  0x39   :  { %311 = vsyncpa [#allocation3], 1 }
  0x3a   :  { %313 = vsyncpa [#allocation3 + $0x1], 1 }

</bundles_post_ra>
